<compile_context>
chip_gen: v5e
topology: v5e:2x2
jax: 0.10.0
libtpu: 0.0.40
codegen_flags: <defaults>
</compile_context>

<pallas_src>
import functools

import jax
import jax.numpy as jnp
from jax import lax
from jax.experimental import pallas as pl
from jax.experimental.pallas import tpu as pltpu


LANE = 128      # TPU lane width (last-dim tiling)
SUBLANE = 8     # f32 sublane tiling (second-to-last dim)


def _round_up(x, m):
    return (x + m - 1) // m * m


def _pick_tile_h(hout, max_rows=8):
    """Largest divisor of `hout` that is <= max_rows (strips tile Hout exactly)."""
    best = 1
    for d in range(1, hout + 1):
        if hout % d == 0 and d <= max_rows:
            best = d
    return best


def _dwconv_kernel(x_ref, wd_ref, bd_ref, wp_ref, bp_ref, o_ref, *, K, th, wout):
    """One (batch image, output-row strip) per grid step.

    x_ref : (1, H, Wp, Cp)        padded input image (resident across strip axis)
    wd_ref: (K, K, Cp)            depthwise weights (f32, channel-padded)
    bd_ref: (1, Cp)               depthwise bias
    wp_ref: (Cp, Coutp)           pointwise weights (bf16, channel-padded)
    bp_ref: (1, Coutp)            pointwise bias
    o_ref : (1, th, wout, Coutp)  output strip (lane-dense, aligned)
    """
    s = pl.program_id(1)
    row0 = s * th                                  # first output row of this strip

    cp = x_ref.shape[-1]
    coutp = o_ref.shape[-1]

    # ---- depthwise KxK, stride 1 (VPU path, f32 accumulate) -----------------
    # Taps are read straight from the ref at (row, col) offsets, so no
    # value-level slices / relayout copies are materialized; lanes are fully
    # dense because channels are padded to a multiple of 128.
    acc = jnp.zeros((th, wout, cp), jnp.float32)
    for ki in range(K):                            # static, unrolled
        for kj in range(K):
            patch = x_ref[0, pl.ds(row0 + ki, th), kj:kj + wout, :]
            w_tap = wd_ref[ki, kj:kj + 1, :]       # (1, Cp) -> broadcast
            acc = acc + patch.astype(jnp.float32) * w_tap.astype(jnp.float32)
    acc = acc + bd_ref[...].astype(jnp.float32)    # (1, Cp) broadcast

    # ---- pointwise 1x1 conv == channel matmul (MXU, bf16 in / f32 acc) ------
    # wout is a multiple of 8, so collapsing (th, wout) is a free relayout.
    lhs = acc.reshape(th * wout, cp).astype(jnp.bfloat16)
    out = jnp.dot(lhs, wp_ref[...], preferred_element_type=jnp.float32)
    out = out + bp_ref[...].astype(jnp.float32)    # (1, Coutp) broadcast
    o_ref[0] = out.reshape(th, wout, coutp).astype(o_ref.dtype)


def dwconv_pallas(x_nhwc, w_dw, b_dw, w_pw, b_pw, *, kernel_size=3):
    """x_nhwc: (N, H, W, C); w_dw: (K, K, C); w_pw: (C, Cout)."""
    N, H, W, C = x_nhwc.shape
    K = kernel_size
    Hout, Wout = H - (K - 1), W - (K - 1)          # stride=1, padding=0, dilation=1
    Cout = w_pw.shape[1]

    # Lane-dense channel padding (no-op when channels are already x128).
    Cp = _round_up(C, LANE)
    Coutp = _round_up(Cout, LANE)
    # Pad output width to a sublane multiple -> aligned collapse + unmasked stores.
    Wout_p = _round_up(Wout, SUBLANE)
    Wp = Wout_p + (K - 1)

    x_p = jnp.pad(x_nhwc, ((0, 0), (0, 0), (0, Wp - W), (0, Cp - C)))
    wd_p = jnp.pad(w_dw, ((0, 0), (0, 0), (0, Cp - C))).astype(jnp.float32)
    bd_p = jnp.pad(b_dw, ((0, Cp - C),)).reshape(1, Cp).astype(jnp.float32)
    wp_p = jnp.pad(w_pw, ((0, Cp - C), (0, Coutp - Cout))).astype(jnp.bfloat16)
    bp_p = jnp.pad(b_pw, ((0, Coutp - Cout),)).reshape(1, Coutp).astype(jnp.float32)

    th = _pick_tile_h(Hout)
    n_strips = Hout // th

    kernel = functools.partial(_dwconv_kernel, K=K, th=th, wout=Wout_p)

    out_p = pl.pallas_call(
        kernel,
        out_shape=jax.ShapeDtypeStruct((N, Hout, Wout_p, Coutp), x_nhwc.dtype),
        grid_spec=pltpu.PrefetchScalarGridSpec(
            num_scalar_prefetch=0,
            grid=(N, n_strips),
            in_specs=[
                # whole (padded) image block, resident across the strip axis
                # TODO(synk): for very large H*W*C, replace with halo'd row-strip
                # DMAs (memory_space=pl.ANY + make_async_copy) to bound VMEM on v7x.
                pl.BlockSpec((1, H, Wp, Cp), lambda n, s: (n, 0, 0, 0)),
                pl.BlockSpec((K, K, Cp), lambda n, s: (0, 0, 0)),
                pl.BlockSpec((1, Cp), lambda n, s: (0, 0)),
                pl.BlockSpec((Cp, Coutp), lambda n, s: (0, 0)),
                pl.BlockSpec((1, Coutp), lambda n, s: (0, 0)),
            ],
            out_specs=pl.BlockSpec((1, th, Wout_p, Coutp),
                                   lambda n, s: (n, s, 0, 0)),
        ),
        compiler_params=pltpu.CompilerParams(
            dimension_semantics=("parallel", "parallel"),
            vmem_limit_bytes=48 * 1024 * 1024),
    )(x_p, wd_p, bd_p, wp_p, bp_p)

    # Trim width / channel padding.
    return out_p[:, :, :Wout, :Cout]


def dwconv_reference(x_nchw, w_dw, b_dw, w_pw, b_pw, *, kernel_size=3):
    """Pure-JAX reference matching PyTorch Conv2d semantics (NCHW, f32)."""
    C = x_nchw.shape[1]
    w_d = jnp.transpose(w_dw, (2, 0, 1))[:, None, :, :]           # (C, 1, K, K)
    y = lax.conv_general_dilated(
        x_nchw, w_d, window_strides=(1, 1), padding='VALID',
        dimension_numbers=('NCHW', 'OIHW', 'NCHW'),
        feature_group_count=C)
    y = y + b_dw[None, :, None, None]
    w_p = jnp.transpose(w_pw, (1, 0))[:, :, None, None]           # (Cout, C, 1, 1)
    z = lax.conv_general_dilated(
        y, w_p, window_strides=(1, 1), padding='VALID',
        dimension_numbers=('NCHW', 'OIHW', 'NCHW'))
    return z + b_pw[None, :, None, None]


if __name__ == "__main__":
    key = jax.random.PRNGKey(0)
    N, C, H, W = 2, 4, 16, 16
    Cout, K = 8, 3

    kx, kwd, kbd, kwp, kbp = jax.random.split(key, 5)
    x_nchw = jax.random.normal(kx, (N, C, H, W), dtype=jnp.float32)
    w_dw = jax.random.normal(kwd, (K, K, C), dtype=jnp.float32) * 0.1   # depthwise weights
    b_dw = jax.random.normal(kbd, (C,), dtype=jnp.float32) * 0.1
    w_pw = jax.random.normal(kwp, (C, Cout), dtype=jnp.float32) * 0.1   # pointwise weights
    b_pw = jax.random.normal(kbp, (Cout,), dtype=jnp.float32) * 0.1

    # NCHW -> NHWC for the kernel
    x_nhwc = jnp.transpose(x_nchw, (0, 2, 3, 1))

    out_nhwc = dwconv_pallas(x_nhwc, w_dw, b_dw, w_pw, b_pw, kernel_size=K)
    out_nhwc = jax.block_until_ready(out_nhwc)

    # sanity check against a pure-JAX f32 reference with PyTorch conv semantics
    out_nchw = jnp.transpose(out_nhwc, (0, 3, 1, 2))
    ref_nchw = dwconv_reference(x_nchw, w_dw, b_dw, w_pw, b_pw, kernel_size=K)
    assert out_nchw.shape == (N, Cout, H - K + 1, W - K + 1)
    # bf16 MXU operands for the pointwise matmul -> relaxed tolerance vs f32 ref
    err = float(jnp.max(jnp.abs(out_nchw - ref_nchw)))
    assert jnp.allclose(out_nchw, ref_nchw, atol=1e-2, rtol=1e-2), err

    print("KERNEL_OK")
</pallas_src>

<mosaic_0001>
module attributes {stable_mosaic.version = 11 : i64} {
  func.func @_dwconv_kernel(%arg0: i32, %arg1: i32, %arg2: memref<1x16x18x128xf32, #tpu.memory_space<vmem>>, %arg3: memref<3x3x128xf32, #tpu.memory_space<vmem>>, %arg4: memref<1x128xf32, #tpu.memory_space<vmem>>, %arg5: memref<128x128xbf16, #tpu.memory_space<vmem>>, %arg6: memref<1x128xf32, #tpu.memory_space<vmem>>, %arg7: memref<1x7x16x128xf32, #tpu.memory_space<vmem>>) attributes {dimension_semantics = [#tpu.dimension_semantics<parallel>, #tpu.dimension_semantics<parallel>], iteration_bounds = array<i64: 2, 2>, scalar_prefetch = 0 : i64, scratch_operands = 0 : i64, tpu.core_type = #tpu.core_type<tc>, window_params = [{transform_indices = @transform_0, window_bounds = array<i64: 1, 16, 18, 128>}, {pipeline_mode = #tpu.pipeline_mode<synchronous>, transform_indices = @transform_1, window_bounds = array<i64: 3, 3, 128>}, {pipeline_mode = #tpu.pipeline_mode<synchronous>, transform_indices = @transform_2, window_bounds = array<i64: 1, 128>}, {pipeline_mode = #tpu.pipeline_mode<synchronous>, transform_indices = @transform_3, window_bounds = array<i64: 128, 128>}, {pipeline_mode = #tpu.pipeline_mode<synchronous>, transform_indices = @transform_4, window_bounds = array<i64: 1, 128>}, {transform_indices = @transform_5, window_bounds = array<i64: 1, 7, 16, 128>}]} {
    %c7_i32 = arith.constant 7 : i32
    %0 = arith.muli %arg1, %c7_i32 : i32
    %cst = arith.constant 0.000000e+00 : f32
    %1 = vector.broadcast %cst : f32 to vector<7x16x128xf32>
    %c0_i32 = arith.constant 0 : i32
    %2 = arith.addi %0, %c0_i32 : i32
    %c0 = arith.constant 0 : index
    %3 = arith.index_cast %2 : i32 to index
    %c0_0 = arith.constant 0 : index
    %c0_1 = arith.constant 0 : index
    %4 = vector.load %arg2[%c0, %3, %c0_0, %c0_1] : memref<1x16x18x128xf32, #tpu.memory_space<vmem>>, vector<1x7x16x128xf32>
    %5 = vector.shape_cast %4 : vector<1x7x16x128xf32> to vector<7x16x128xf32>
    %c0_2 = arith.constant 0 : index
    %c0_3 = arith.constant 0 : index
    %c0_4 = arith.constant 0 : index
    %6 = vector.load %arg3[%c0_2, %c0_3, %c0_4] : memref<3x3x128xf32, #tpu.memory_space<vmem>>, vector<1x1x128xf32>
    %7 = vector.shape_cast %6 : vector<1x1x128xf32> to vector<1x128xf32>
    %8 = vector.shape_cast %7 : vector<1x128xf32> to vector<1x1x128xf32>
    %9 = vector.broadcast %8 : vector<1x1x128xf32> to vector<7x16x128xf32>
    %10 = arith.mulf %5, %9 : vector<7x16x128xf32>
    %11 = arith.addf %1, %10 : vector<7x16x128xf32>
    %c0_i32_5 = arith.constant 0 : i32
    %12 = arith.addi %0, %c0_i32_5 : i32
    %c0_6 = arith.constant 0 : index
    %13 = arith.index_cast %12 : i32 to index
    %c1 = arith.constant 1 : index
    %c0_7 = arith.constant 0 : index
    %14 = vector.load %arg2[%c0_6, %13, %c1, %c0_7] : memref<1x16x18x128xf32, #tpu.memory_space<vmem>>, vector<1x7x16x128xf32>
    %15 = vector.shape_cast %14 : vector<1x7x16x128xf32> to vector<7x16x128xf32>
    %c0_8 = arith.constant 0 : index
    %c1_9 = arith.constant 1 : index
    %c0_10 = arith.constant 0 : index
    %16 = vector.load %arg3[%c0_8, %c1_9, %c0_10] : memref<3x3x128xf32, #tpu.memory_space<vmem>>, vector<1x1x128xf32>
    %17 = vector.shape_cast %16 : vector<1x1x128xf32> to vector<1x128xf32>
    %18 = vector.shape_cast %17 : vector<1x128xf32> to vector<1x1x128xf32>
    %19 = vector.broadcast %18 : vector<1x1x128xf32> to vector<7x16x128xf32>
    %20 = arith.mulf %15, %19 : vector<7x16x128xf32>
    %21 = arith.addf %11, %20 : vector<7x16x128xf32>
    %c0_i32_11 = arith.constant 0 : i32
    %22 = arith.addi %0, %c0_i32_11 : i32
    %c0_12 = arith.constant 0 : index
    %23 = arith.index_cast %22 : i32 to index
    %c2 = arith.constant 2 : index
    %c0_13 = arith.constant 0 : index
    %24 = vector.load %arg2[%c0_12, %23, %c2, %c0_13] : memref<1x16x18x128xf32, #tpu.memory_space<vmem>>, vector<1x7x16x128xf32>
    %25 = vector.shape_cast %24 : vector<1x7x16x128xf32> to vector<7x16x128xf32>
    %c0_14 = arith.constant 0 : index
    %c2_15 = arith.constant 2 : index
    %c0_16 = arith.constant 0 : index
    %26 = vector.load %arg3[%c0_14, %c2_15, %c0_16] : memref<3x3x128xf32, #tpu.memory_space<vmem>>, vector<1x1x128xf32>
    %27 = vector.shape_cast %26 : vector<1x1x128xf32> to vector<1x128xf32>
    %28 = vector.shape_cast %27 : vector<1x128xf32> to vector<1x1x128xf32>
    %29 = vector.broadcast %28 : vector<1x1x128xf32> to vector<7x16x128xf32>
    %30 = arith.mulf %25, %29 : vector<7x16x128xf32>
    %31 = arith.addf %21, %30 : vector<7x16x128xf32>
    %c1_i32 = arith.constant 1 : i32
    %32 = arith.addi %0, %c1_i32 : i32
    %c0_17 = arith.constant 0 : index
    %33 = arith.index_cast %32 : i32 to index
    %c0_18 = arith.constant 0 : index
    %c0_19 = arith.constant 0 : index
    %34 = vector.load %arg2[%c0_17, %33, %c0_18, %c0_19] : memref<1x16x18x128xf32, #tpu.memory_space<vmem>>, vector<1x7x16x128xf32>
    %35 = vector.shape_cast %34 : vector<1x7x16x128xf32> to vector<7x16x128xf32>
    %c1_20 = arith.constant 1 : index
    %c0_21 = arith.constant 0 : index
    %c0_22 = arith.constant 0 : index
    %36 = vector.load %arg3[%c1_20, %c0_21, %c0_22] : memref<3x3x128xf32, #tpu.memory_space<vmem>>, vector<1x1x128xf32>
    %37 = vector.shape_cast %36 : vector<1x1x128xf32> to vector<1x128xf32>
    %38 = vector.shape_cast %37 : vector<1x128xf32> to vector<1x1x128xf32>
    %39 = vector.broadcast %38 : vector<1x1x128xf32> to vector<7x16x128xf32>
    %40 = arith.mulf %35, %39 : vector<7x16x128xf32>
    %41 = arith.addf %31, %40 : vector<7x16x128xf32>
    %c1_i32_23 = arith.constant 1 : i32
    %42 = arith.addi %0, %c1_i32_23 : i32
    %c0_24 = arith.constant 0 : index
    %43 = arith.index_cast %42 : i32 to index
    %c1_25 = arith.constant 1 : index
    %c0_26 = arith.constant 0 : index
    %44 = vector.load %arg2[%c0_24, %43, %c1_25, %c0_26] : memref<1x16x18x128xf32, #tpu.memory_space<vmem>>, vector<1x7x16x128xf32>
    %45 = vector.shape_cast %44 : vector<1x7x16x128xf32> to vector<7x16x128xf32>
    %c1_27 = arith.constant 1 : index
    %c1_28 = arith.constant 1 : index
    %c0_29 = arith.constant 0 : index
    %46 = vector.load %arg3[%c1_27, %c1_28, %c0_29] : memref<3x3x128xf32, #tpu.memory_space<vmem>>, vector<1x1x128xf32>
    %47 = vector.shape_cast %46 : vector<1x1x128xf32> to vector<1x128xf32>
    %48 = vector.shape_cast %47 : vector<1x128xf32> to vector<1x1x128xf32>
    %49 = vector.broadcast %48 : vector<1x1x128xf32> to vector<7x16x128xf32>
    %50 = arith.mulf %45, %49 : vector<7x16x128xf32>
    %51 = arith.addf %41, %50 : vector<7x16x128xf32>
    %c1_i32_30 = arith.constant 1 : i32
    %52 = arith.addi %0, %c1_i32_30 : i32
    %c0_31 = arith.constant 0 : index
    %53 = arith.index_cast %52 : i32 to index
    %c2_32 = arith.constant 2 : index
    %c0_33 = arith.constant 0 : index
    %54 = vector.load %arg2[%c0_31, %53, %c2_32, %c0_33] : memref<1x16x18x128xf32, #tpu.memory_space<vmem>>, vector<1x7x16x128xf32>
    %55 = vector.shape_cast %54 : vector<1x7x16x128xf32> to vector<7x16x128xf32>
    %c1_34 = arith.constant 1 : index
    %c2_35 = arith.constant 2 : index
    %c0_36 = arith.constant 0 : index
    %56 = vector.load %arg3[%c1_34, %c2_35, %c0_36] : memref<3x3x128xf32, #tpu.memory_space<vmem>>, vector<1x1x128xf32>
    %57 = vector.shape_cast %56 : vector<1x1x128xf32> to vector<1x128xf32>
    %58 = vector.shape_cast %57 : vector<1x128xf32> to vector<1x1x128xf32>
    %59 = vector.broadcast %58 : vector<1x1x128xf32> to vector<7x16x128xf32>
    %60 = arith.mulf %55, %59 : vector<7x16x128xf32>
    %61 = arith.addf %51, %60 : vector<7x16x128xf32>
    %c2_i32 = arith.constant 2 : i32
    %62 = arith.addi %0, %c2_i32 : i32
    %c0_37 = arith.constant 0 : index
    %63 = arith.index_cast %62 : i32 to index
    %c0_38 = arith.constant 0 : index
    %c0_39 = arith.constant 0 : index
    %64 = vector.load %arg2[%c0_37, %63, %c0_38, %c0_39] : memref<1x16x18x128xf32, #tpu.memory_space<vmem>>, vector<1x7x16x128xf32>
    %65 = vector.shape_cast %64 : vector<1x7x16x128xf32> to vector<7x16x128xf32>
    %c2_40 = arith.constant 2 : index
    %c0_41 = arith.constant 0 : index
    %c0_42 = arith.constant 0 : index
    %66 = vector.load %arg3[%c2_40, %c0_41, %c0_42] : memref<3x3x128xf32, #tpu.memory_space<vmem>>, vector<1x1x128xf32>
    %67 = vector.shape_cast %66 : vector<1x1x128xf32> to vector<1x128xf32>
    %68 = vector.shape_cast %67 : vector<1x128xf32> to vector<1x1x128xf32>
    %69 = vector.broadcast %68 : vector<1x1x128xf32> to vector<7x16x128xf32>
    %70 = arith.mulf %65, %69 : vector<7x16x128xf32>
    %71 = arith.addf %61, %70 : vector<7x16x128xf32>
    %c2_i32_43 = arith.constant 2 : i32
    %72 = arith.addi %0, %c2_i32_43 : i32
    %c0_44 = arith.constant 0 : index
    %73 = arith.index_cast %72 : i32 to index
    %c1_45 = arith.constant 1 : index
    %c0_46 = arith.constant 0 : index
    %74 = vector.load %arg2[%c0_44, %73, %c1_45, %c0_46] : memref<1x16x18x128xf32, #tpu.memory_space<vmem>>, vector<1x7x16x128xf32>
    %75 = vector.shape_cast %74 : vector<1x7x16x128xf32> to vector<7x16x128xf32>
    %c2_47 = arith.constant 2 : index
    %c1_48 = arith.constant 1 : index
    %c0_49 = arith.constant 0 : index
    %76 = vector.load %arg3[%c2_47, %c1_48, %c0_49] : memref<3x3x128xf32, #tpu.memory_space<vmem>>, vector<1x1x128xf32>
    %77 = vector.shape_cast %76 : vector<1x1x128xf32> to vector<1x128xf32>
    %78 = vector.shape_cast %77 : vector<1x128xf32> to vector<1x1x128xf32>
    %79 = vector.broadcast %78 : vector<1x1x128xf32> to vector<7x16x128xf32>
    %80 = arith.mulf %75, %79 : vector<7x16x128xf32>
    %81 = arith.addf %71, %80 : vector<7x16x128xf32>
    %c2_i32_50 = arith.constant 2 : i32
    %82 = arith.addi %0, %c2_i32_50 : i32
    %c0_51 = arith.constant 0 : index
    %83 = arith.index_cast %82 : i32 to index
    %c2_52 = arith.constant 2 : index
    %c0_53 = arith.constant 0 : index
    %84 = vector.load %arg2[%c0_51, %83, %c2_52, %c0_53] : memref<1x16x18x128xf32, #tpu.memory_space<vmem>>, vector<1x7x16x128xf32>
    %85 = vector.shape_cast %84 : vector<1x7x16x128xf32> to vector<7x16x128xf32>
    %c2_54 = arith.constant 2 : index
    %c2_55 = arith.constant 2 : index
    %c0_56 = arith.constant 0 : index
    %86 = vector.load %arg3[%c2_54, %c2_55, %c0_56] : memref<3x3x128xf32, #tpu.memory_space<vmem>>, vector<1x1x128xf32>
    %87 = vector.shape_cast %86 : vector<1x1x128xf32> to vector<1x128xf32>
    %88 = vector.shape_cast %87 : vector<1x128xf32> to vector<1x1x128xf32>
    %89 = vector.broadcast %88 : vector<1x1x128xf32> to vector<7x16x128xf32>
    %90 = arith.mulf %85, %89 : vector<7x16x128xf32>
    %91 = arith.addf %81, %90 : vector<7x16x128xf32>
    %c0_57 = arith.constant 0 : index
    %c0_58 = arith.constant 0 : index
    %92 = vector.load %arg4[%c0_57, %c0_58] : memref<1x128xf32, #tpu.memory_space<vmem>>, vector<1x128xf32>
    %93 = vector.shape_cast %92 : vector<1x128xf32> to vector<1x1x128xf32>
    %94 = vector.broadcast %93 : vector<1x1x128xf32> to vector<7x16x128xf32>
    %95 = arith.addf %91, %94 : vector<7x16x128xf32>
    %96 = vector.shape_cast %95 : vector<7x16x128xf32> to vector<112x128xf32>
    %97 = arith.truncf %96 : vector<112x128xf32> to vector<112x128xbf16>
    %c0_59 = arith.constant 0 : index
    %c0_60 = arith.constant 0 : index
    %98 = vector.load %arg5[%c0_59, %c0_60] : memref<128x128xbf16, #tpu.memory_space<vmem>>, vector<128x128xbf16>
    %cst_61 = arith.constant dense<0.000000e+00> : vector<112x128xf32>
    %99 = tpu.matmul %97, %98, %cst_61 {dimension_numbers = #tpu.dot_dimension_numbers<[1], [0], [0], [1], [0, 0, 1, 1], [], []>} : vector<112x128xbf16>, vector<128x128xbf16>, vector<112x128xf32> -> vector<112x128xf32>
    %c0_62 = arith.constant 0 : index
    %c0_63 = arith.constant 0 : index
    %100 = vector.load %arg6[%c0_62, %c0_63] : memref<1x128xf32, #tpu.memory_space<vmem>>, vector<1x128xf32>
    %101 = vector.broadcast %100 : vector<1x128xf32> to vector<112x128xf32>
    %102 = arith.addf %99, %101 : vector<112x128xf32>
    %103 = vector.shape_cast %102 : vector<112x128xf32> to vector<7x16x128xf32>
    %c0_64 = arith.constant 0 : index
    %c0_65 = arith.constant 0 : index
    %c0_66 = arith.constant 0 : index
    %c0_67 = arith.constant 0 : index
    %104 = vector.load %arg7[%c0_64, %c0_65, %c0_66, %c0_67] : memref<1x7x16x128xf32, #tpu.memory_space<vmem>>, vector<1x7x16x128xf32>
    %105 = vector.shape_cast %104 : vector<1x7x16x128xf32> to vector<7x16x128xf32>
    %106 = vector.shape_cast %103 : vector<7x16x128xf32> to vector<1x7x16x128xf32>
    tpu.vector_store %arg7[%c0_64, %c0_65, %c0_66, %c0_67], %106 {strides = array<i32>} : memref<1x7x16x128xf32, #tpu.memory_space<vmem>>, vector<1x7x16x128xf32>,
    return
  }
  func.func @transform_0(%arg0: i32, %arg1: i32) -> (i32, i32, i32, i32) {
    %c0_i32 = arith.constant 0 : i32
    %c0_i32_0 = arith.constant 0 : i32
    %c0_i32_1 = arith.constant 0 : i32
    %c0_i32_2 = arith.constant 0 : i32
    return %arg0, %c0_i32, %c0_i32_0, %c0_i32_1 : i32, i32, i32, i32
  }
  func.func @transform_1(%arg0: i32, %arg1: i32) -> (i32, i32, i32) {
    %c0_i32 = arith.constant 0 : i32
    %c0_i32_0 = arith.constant 0 : i32
    %c0_i32_1 = arith.constant 0 : i32
    %c0_i32_2 = arith.constant 0 : i32
    return %c0_i32, %c0_i32_0, %c0_i32_1 : i32, i32, i32
  }
  func.func @transform_2(%arg0: i32, %arg1: i32) -> (i32, i32) {
    %c0_i32 = arith.constant 0 : i32
    %c0_i32_0 = arith.constant 0 : i32
    %c0_i32_1 = arith.constant 0 : i32
    return %c0_i32, %c0_i32_0 : i32, i32
  }
  func.func @transform_3(%arg0: i32, %arg1: i32) -> (i32, i32) {
    %c0_i32 = arith.constant 0 : i32
    %c0_i32_0 = arith.constant 0 : i32
    %c0_i32_1 = arith.constant 0 : i32
    return %c0_i32, %c0_i32_0 : i32, i32
  }
  func.func @transform_4(%arg0: i32, %arg1: i32) -> (i32, i32) {
    %c0_i32 = arith.constant 0 : i32
    %c0_i32_0 = arith.constant 0 : i32
    %c0_i32_1 = arith.constant 0 : i32
    return %c0_i32, %c0_i32_0 : i32, i32
  }
  func.func @transform_5(%arg0: i32, %arg1: i32) -> (i32, i32, i32, i32) {
    %c0_i32 = arith.constant 0 : i32
    %c0_i32_0 = arith.constant 0 : i32
    %c0_i32_1 = arith.constant 0 : i32
    return %arg0, %arg1, %c0_i32, %c0_i32_0 : i32, i32, i32, i32
  }
}

</mosaic_0001>

<bundles_post_ra>
// kernel: tpu_custom_call.1
= control target key start
LH: loop header
LB: loop body
LE: loop exit
PB: predicated region body
PF: predicated region fallthrough
CT: control target
= control target key end

     0   :  { %10 = vsyncpa [#allocation3], 0  ;;  %s1897_s0 = inlined_call_operand.vmem [shape: f32[2,16,18,128], index: 0, kind: input, shape index: {}]   ;;  %s1898_s1 = inlined_call_operand.vmem [shape: f32[3,3,128], index: 1, kind: input, shape index: {}]   ;;  %s1899_s2 = inlined_call_operand.vmem [shape: f32[1,128], index: 2, kind: input, shape index: {}]   ;;  %s1900_s3 = inlined_call_operand.vmem [shape: bf16[128,128], index: 3, kind: input, shape index: {}]   ;;  %s1901_s4 = inlined_call_operand.vmem [shape: f32[1,128], index: 4, kind: input, shape index: {}]   ;;  %s1902_s5 = inlined_call_operand.hbm [shape: f32[2,14,16,128], index: 5, kind: output, shape index: {}]  }
   0x1   :  { %12 = vsyncpa [#allocation3 + $0x1], 0  ;;  %s1284_s18 = smov 0   ;;  %s1286_s19 = smov 0  }
   0x2   :  { %s1288_s20 = smov 0   ;;  %s1290_s21 = smov 0  }
   0x3   :  { %s1292_s22 = smov 0   ;;  %s1294_s23 = smov 0  }
   0x4   :  { %s1296_s24 = smov 0   ;;  %s1298_s25 = smov 0  }
   0x5 LB: > { %s901_s26 = sadd.s32 4294967295, %s1250_s25   ;;  %s902_s27 = sadd.s32 4294967294, %s1250_s25   ;;  %s1250_s25 = sphi %s1298_s25, %s18_s25   ;;  %s1246_s24 = sphi %s1296_s24, %s1978_s24   ;;  %s1242_s23 = sphi %s1294_s23, %s1977_s23   ;;  %s1238_s22 = sphi %s1292_s22, %s1976_s22   ;;  %s1234_s21 = sphi %s1290_s21, %s1975_s21   ;;  %s1230_s20 = sphi %s1288_s20, %s1974_s20   ;;  %s1226_s19 = sphi %s1286_s19, %s1973_s19   ;;  %s1222_s18 = sphi %s1284_s18, %s1972_s18  }
   0x6   : > { %s27_s28 = sadd.s32 1, %s1242_s23  ;;  %s30_s29 = sadd.s32 1, %s1246_s24 }
   0x7   : > { %p28_p0 = scmp.ge.s32.totalorder %s27_s28, 2  ;;  %p159_p1 = scmp.ne.s32.totalorder %s1230_s20, %s1226_s19 }
   0x8   : > { %p160_p2 = scmp.eq.s32.totalorder %s901_s26, 3  ;;  %p165_p5 = scmp.ne.s32.totalorder %s1226_s19, %s1222_s18 }
   0x9   : > { %s1980_s28 = smov (%p28_p0, %s27_s28), 0  ;;  %s1982_s29 = smov (!%p28_p0, %s30_s29), %s1246_s24 }
   0xa   : > { %s145_s30 = ssub.s32 %s1242_s23, %s1980_s28  ;;  %p1335_p3 = por %p160_p2, %p159_p1 }
   0xb   : > { %p32_p4 = scmp.ge.s32.totalorder %s1982_s29, 2  ;;  %p166_p6 = scmp.eq.s32.totalorder %s902_s27, 3 }
   0xc   : > { %p905_p7 = scmp.ge.s32.totalorder %s1250_s25, 1  ;;  %p204_p9 = scmp.lt.s32.totalorder %s1250_s25, 5 }
   0xd   : > { %s1984_s29 = smov (%p32_p4, %s1982_s29), 0  ;;  %p1344_p8 = por %p166_p6, %p165_p5 }
   0xe   : > { %1931 = sst [smem:[#allocation5_spill]] %s1984_s29  ;;  %s144_s8 = ssub.s32 %s1246_s24, %s1984_s29 }
   0xf   : > { %s149_s9 = sadd.s32 1, %s1230_s20  ;;  %s146_s10 = sor.u32 %s145_s30, %s144_s8 }
  0x10   : > { %p205_p10 = pnand %p905_p7, %p204_p9  ;;  %p147_p11 = scmp.eq.s32.totalorder %s146_s10, 0 }
  0x12   : > { %s1353_s11 = scalar_select %p147_p11, %s1230_s20, %s149_s9  }
  0x13   : > { %208 = sbr.rel (%p205_p10) target bundleno = 258 (0x102), region = 40 }
  0x18   : > { %v1043_v0 = vld [vmem:[%s1900_s3 + $0x38] sm:$0xff]  ;;  %p232_p12 = scmp.lt.s32.totalorder %s1238_s22, 1  ;;  %s907_s14 = smul.u32 168, %s1234_s21  ;;  %v1042_v1 = vld [vmem:[%s1900_s3 + $0x30] sm:$0xff]  ;;  %v1367_v2 = vld [vmem:[%s1898_s1] ss:$0 sm:$0xff] }
  0x19   : > { %1045 = vmatpush.bf16.msra.mxu1 %v1043_v0  ;;  %1046 = vmatpush.bf16.msra.mxu2 %v1043_v0  ;;  %v1372_v3 = vld [vmem:[%s1898_s1 + $0x1] ss:$0 sm:$0xff]  ;;  %v1041_v4 = vld [vmem:[%s1900_s3 + $0x28] sm:$0xff]  ;;  %v1380_v5 = vld [vmem:[%s1898_s1 + $0x2] ss:$0 sm:$0xff]  ;;  %s1071_s10 = smul.u32 28, %s1238_s22 }
  0x1a   : > { %s233_s17 = scalar_select %p232_p12, %s1238_s22, 1  ;;  %1047 = vmatpush.bf16.msra.mxu3 %v1043_v0  ;;  %738 = vmatpush.bf16.msra.mxu0 %v1043_v0  ;;  %v1385_v6 = vld [vmem:[%s1898_s1 + $0x4] ss:$0 sm:$0xff]  ;;  %v1393_v7 = vld [vmem:[%s1898_s1 + $0x5] ss:$0 sm:$0xff]  ;;  %v1039_v32 = vld [vmem:[%s1900_s3 + $0x18] sm:$0xff] }
  0x1b   : > { %v1398_v8 = vld [vmem:[%s1898_s1 + $0x6] ss:$0 sm:$0xff]  ;;  %v1405_v9 = vld [vmem:[%s1898_s1 + $0x8] ss:$0 sm:$0xff]  ;;  %v1492_v45 = vld [vmem:[%s1898_s1 + $0x9] ss:$0 sm:$0xff] }
  0x1c   : > { %s1070_s12 = smul.u32 384, %s233_s17  ;;  %v1040_v10 = vld [vmem:[%s1900_s3 + $0x20] sm:$0xff]  ;;  %v1503_v49 = vld [vmem:[%s1898_s1 + $0xa] ss:$0 sm:$0xff] }
  0x1d   : > { %1048 = vmatpush.bf16.msra.mxu1 %v1042_v1  ;;  %1049 = vmatpush.bf16.msra.mxu2 %v1042_v1  ;;  %s1044_s17 = smul.u32 14, %s1234_s21 }
  0x1e   : > { %s236_s30 = scalar_lea.vmem %s1897_s0, %s1070_s12  ;;  %1050 = vmatpush.bf16.msra.mxu3 %v1042_v1  ;;  %739 = vmatpush.bf16.msra.mxu0 %v1042_v1 }
  0x1f   : > { %s1400_s29 = scalar_lea.vmem %s236_s30, %s907_s14  ;;  %s809_s13 = sadd.s32 %s1071_s10, %s1044_s17 }
  0x20   : > { %v1411_v11 = vld [vmem:[%s1400_s29 + $0x18] sm:$0xff]  ;;  %v1414_v12 = vld [vmem:[%s1400_s29 + $0x20] sm:$0xff]  ;;  %v1441_v23 = vld [vmem:[%s1400_s29 + $0x30] sm:$0xff]  ;;  %s1033_s15 = sshll.u32 %s809_s13, 3  ;;  %s1176_s10 = scalar_lea.hbm %s1902_s5, 448 }
  0x21   : > { %v1417_v13 = vld [vmem:[%s1400_s29 + $0x19] sm:$0xff]  ;;  %v259_v14 = vmul.f32 %v1367_v2, %v1411_v11  ;;  %v260_v15 = vmul.f32 %v1367_v2, %v1414_v12  ;;  %v1424_v16 = vld [vmem:[%s1400_s29 + $0x21] sm:$0xff]  ;;  %1051 = vmatpush.bf16.msra.mxu1 %v1041_v4  ;;  %1052 = vmatpush.bf16.msra.mxu2 %v1041_v4  ;;  %v1447_v25 = vld [vmem:[%s1400_s29 + $0x31] sm:$0xff]  ;;  %v395_v27 = vmul.f32 %v1385_v6, %v1441_v23  ;;  %s811_s14 = scalar_lea.hbm %s1902_s5, %s1033_s15 }
  0x22   : > { %v303_v17 = vmul.f32 %v1372_v3, %v1417_v13  ;;  %v1429_v18 = vld [vmem:[%s1400_s29 + $0x1a] sm:$0xff]  ;;  %v1432_v19 = vld [vmem:[%s1400_s29 + $0x22] sm:$0xff]  ;;  %v304_v20 = vmul.f32 %v1372_v3, %v1424_v16  ;;  %1053 = vmatpush.bf16.msra.mxu3 %v1041_v4  ;;  %740 = vmatpush.bf16.msra.mxu0 %v1041_v4  ;;  %v1457_v30 = vld [vmem:[%s1400_s29 + $0x32] sm:$0xff]  ;;  %v439_v34 = vmul.f32 %v1393_v7, %v1447_v25  ;;  %s814_s21 = sshll.u32 %s811_s14, 4  ;;  %s815_s21 = int_to_ptr.hbm [resolvable:$true] %s814_s21 }
  0x23   : > { %v347_v21 = vmul.f32 %v1380_v5, %v1429_v18  ;;  %v348_v22 = vmul.f32 %v1380_v5, %v1432_v19  ;;  %v1444_v24 = vld [vmem:[%s1400_s29 + $0x38] sm:$0xff]  ;;  %v483_v36 = vmul.f32 %v1398_v8, %v1457_v30  ;;  %v1472_v37 = vld [vmem:[%s1400_s29 + $0x48] sm:$0xff]  ;;  %v1475_v38 = vld [vmem:[%s1400_s29 + $0x50] sm:$0xff] }
  0x24   : > { %v317_v26 = vadd.f32 %v303_v17, %v259_v14  ;;  %v396_v28 = vmul.f32 %v1385_v6, %v1444_v24  ;;  %v1454_v29 = vld [vmem:[%s1400_s29 + $0x39] sm:$0xff]  ;;  %v318_v33 = vadd.f32 %v304_v20, %v260_v15  ;;  %v1478_v39 = vld [vmem:[%s1400_s29 + $0x49] sm:$0xff]  ;;  %v531_v42 = vmul.f32 %v1405_v9, %v1472_v37  ;;  %v1487_v44 = vld [vmem:[%s1400_s29 + $0x51] sm:$0xff] }
  0x25   : > { %v1460_v31 = vld [vmem:[%s1400_s29 + $0x3a] sm:$0xff]  ;;  %v440_v35 = vmul.f32 %v1393_v7, %v1454_v29  ;;  %v532_v43 = vmul.f32 %v1405_v9, %v1475_v38  ;;  %v1495_v46 = vld [vmem:[%s1400_s29 + $0x4a] sm:$0xff]  ;;  %1054 = vmatpush.bf16.msra.mxu1 %v1040_v10  ;;  %1055 = vmatpush.bf16.msra.mxu2 %v1040_v10  ;;  %v1498_v48 = vld [vmem:[%s1400_s29 + $0x52] sm:$0xff]  ;;  %v263_v50 = vmul.f32 %v1367_v2, %v1472_v37 }
  0x26   : > { %v361_v40 = vadd.f32 %v347_v21, %v317_v26  ;;  %v484_v41 = vmul.f32 %v1398_v8, %v1460_v31  ;;  %v362_v47 = vadd.f32 %v348_v22, %v318_v33  ;;  %v264_v51 = vmul.f32 %v1367_v2, %v1475_v38  ;;  %1056 = vmatpush.bf16.msra.mxu3 %v1040_v10  ;;  %v1514_v55 = vld [vmem:[%s1400_s29 + $0x60] sm:$0xff]  ;;  %v1523_v60 = vld [vmem:[%s1400_s29 + $0x68] sm:$0xff] }
  0x27   : > { %741 = vmatpush.bf16.msra.mxu0 %v1040_v10  ;;  %v575_v53 = vmul.f32 %v1492_v45, %v1478_v39  ;;  %v576_v54 = vmul.f32 %v1492_v45, %v1487_v44  ;;  %v619_v57 = vmul.f32 %v1503_v49, %v1495_v46  ;;  %v620_v58 = vmul.f32 %v1503_v49, %v1498_v48  ;;  %v1532_v1 = vld [vmem:[%s1400_s29 + $0x61] sm:$0xff]  ;;  %v1535_v4 = vld [vmem:[%s1400_s29 + $0x69] sm:$0xff] }
  0x28   : > { %v409_v52 = vadd.f32 %v395_v27, %v361_v40  ;;  %v410_v56 = vadd.f32 %v396_v28, %v362_v47  ;;  %v307_v59 = vmul.f32 %v1372_v3, %v1478_v39  ;;  %v308_v62 = vmul.f32 %v1372_v3, %v1487_v44  ;;  %v1038_v10 = vld [vmem:[%s1900_s3 + $0x10] sm:$0xff]  ;;  %v1543_v20 = vld [vmem:[%s1400_s29 + $0x62] sm:$0xff] }
  0x29   : > { %v351_v63 = vmul.f32 %v1380_v5, %v1495_v46  ;;  %v352_v0 = vmul.f32 %v1380_v5, %v1498_v48  ;;  %1057 = vmatpush.bf16.msra.mxu1 %v1039_v32  ;;  %1058 = vmatpush.bf16.msra.mxu2 %v1039_v32  ;;  %v399_v17 = vmul.f32 %v1385_v6, %v1514_v55  ;;  %v1546_v21 = vld [vmem:[%s1400_s29 + $0x6a] sm:$0xff] }
  0x2a   : > { %v453_v61 = vadd.f32 %v439_v34, %v409_v52  ;;  %v454_v14 = vadd.f32 %v440_v35, %v410_v56  ;;  %v321_v15 = vadd.f32 %v307_v59, %v263_v50  ;;  %1933 = vst [vmem:[#allocation6_spill] sm:$0xff] %v1546_v21  ;;  %1059 = vmatpush.bf16.msra.mxu3 %v1039_v32  ;;  %v1559_v50 = vld [vmem:[%s1400_s29 + $0x78] sm:$0xff]  ;;  %v1565_v52 = vld [vmem:[%s1400_s29 + $0x80] sm:$0xff] }
  0x2b   : > { %742 = vmatpush.bf16.msra.mxu0 %v1039_v32  ;;  %v322_v26 = vadd.f32 %v308_v62, %v264_v51  ;;  %v400_v27 = vmul.f32 %v1385_v6, %v1523_v60  ;;  %v443_v34 = vmul.f32 %v1393_v7, %v1532_v1  ;;  %v444_v35 = vmul.f32 %v1393_v7, %v1535_v4  ;;  %v1570_v59 = vld [vmem:[%s1400_s29 + $0x79] sm:$0xff] }
  0x2c   : > { %v497_v22 = vadd.f32 %v483_v36, %v453_v61  ;;  %v498_v28 = vadd.f32 %v484_v41, %v454_v14  ;;  %v365_v33 = vadd.f32 %v351_v63, %v321_v15  ;;  %v487_v32 = vmul.f32 %v1398_v8, %v1543_v20  ;;  %1934 = vst [vmem:[#allocation7_spill] sm:$0xff] %v1559_v50  ;;  %v1037_v41 = vld [vmem:[%s1900_s3 + $0x8] sm:$0xff]  ;;  %v1575_v62 = vld [vmem:[%s1899_s2] ss:$0 sm:$0xff] }
  0x2d   : > { %v366_v47 = vadd.f32 %v352_v0, %v322_v26  ;;  %v488_v36 = vmul.f32 %v1398_v8, %v1546_v21  ;;  %1060 = vmatpush.bf16.msra.mxu1 %v1038_v10  ;;  %1061 = vmatpush.bf16.msra.mxu2 %v1038_v10  ;;  %1935 = vst [vmem:[#allocation8_spill] sm:$0xff] %v1565_v52  ;;  %v1580_v0 = vld [vmem:[%s1400_s29 + $0x81] sm:$0xff] }
  0x2e   : > { %v545_v40 = vadd.f32 %v531_v42, %v497_v22  ;;  %v546_v51 = vadd.f32 %v532_v43, %v498_v28  ;;  %v413_v42 = vadd.f32 %v399_v17, %v365_v33  ;;  %v535_v56 = vmul.f32 %v1405_v9, %v1559_v50  ;;  %1936 = vst [vmem:[#allocation9_spill] sm:$0xff] %v1570_v59  ;;  %v1585_v15 = vld [vmem:[%s1400_s29 + $0x7a] sm:$0xff]  ;;  %v1590_v26 = vld [vmem:[%s1400_s29 + $0x82] sm:$0xff] }
  0x2f   : > { %1062 = vmatpush.bf16.msra.mxu3 %v1038_v10  ;;  %v414_v63 = vadd.f32 %v400_v27, %v366_v47  ;;  %v536_v43 = vmul.f32 %v1405_v9, %v1565_v52  ;;  %1937 = vst [vmem:[#allocation10_spill] sm:$0xff] %v1580_v0  ;;  %v579_v14 = vmul.f32 %v1492_v45, %v1570_v59 }
  0x30   : > { %v589_v61 = vadd.f32 %v575_v53, %v545_v40  ;;  %1938 = vst [vmem:[#allocation11_spill] sm:$0xff] %v1585_v15  ;;  %v590_v17 = vadd.f32 %v576_v54, %v546_v51  ;;  %v457_v22 = vadd.f32 %v443_v34, %v413_v42  ;;  %v580_v53 = vmul.f32 %v1492_v45, %v1580_v0  ;;  %v1036_v34 = vld [vmem:[%s1900_s3] sm:$0xff] }
  0x31   : > { %1939 = vst [vmem:[#allocation12_spill] sm:$0xff] %v1590_v26  ;;  %v623_v27 = vmul.f32 %v1503_v49, %v1585_v15  ;;  %743 = vmatpush.bf16.msra.mxu0 %v1038_v10  ;;  %v458_v33 = vadd.f32 %v444_v35, %v414_v63  ;;  %v624_v40 = vmul.f32 %v1503_v49, %v1590_v26  ;;  %v1604_v10 = vld [vmem:[%s1400_s29 + $0x90] sm:$0xff] }
  0x32   : > { %v633_v28 = vadd.f32 %v619_v57, %v589_v61  ;;  %v267_v54 = vmul.f32 %v1367_v2, %v1559_v50  ;;  %1063 = vmatpush.bf16.msra.mxu1 %v1037_v41  ;;  %1064 = vmatpush.bf16.msra.mxu2 %v1037_v41  ;;  %v634_v47 = vadd.f32 %v620_v58, %v590_v17  ;;  %v1612_v58 = vld [vmem:[%s1400_s29 + $0x98] sm:$0xff] }
  0x33   : > { %v501_v51 = vadd.f32 %v487_v32, %v457_v22  ;;  %v268_v57 = vmul.f32 %v1367_v2, %v1565_v52  ;;  %1940 = vst [vmem:[#allocation13_spill] sm:$0xff] %v1604_v10  ;;  %1065 = vmatpush.bf16.msra.mxu3 %v1037_v41  ;;  %v502_v42 = vadd.f32 %v488_v36, %v458_v33  ;;  %v1620_v36 = vld [vmem:[%s1400_s29 + $0x91] sm:$0xff] }
  0x34   : > { %v651_v35 = vadd.f32 %v1575_v62, %v633_v28  ;;  %v311_v61 = vmul.f32 %v1372_v3, %v1570_v59  ;;  %v312_v63 = vmul.f32 %v1372_v3, %v1580_v0  ;;  %1941 = vst [vmem:[#allocation14_spill] sm:$0xff] %v1612_v58  ;;  %v652_v32 = vadd.f32 %v1575_v62, %v634_v47  ;;  %v1625_v47 = vld [vmem:[%s1400_s29 + $0x99] sm:$0xff] }
  0x35   : > { %v549_v17 = vadd.f32 %v535_v56, %v501_v51  ;;  %v355_v22 = vmul.f32 %v1380_v5, %v1585_v15  ;;  %v356_v28 = vmul.f32 %v1380_v5, %v1590_v26  ;;  %1942 = vst [vmem:[#allocation15_spill] sm:$0xff] %v1620_v36  ;;  %744 = vmatpush.bf16.msra.mxu0 %v1037_v41  ;;  %v1628_v56 = vld [vmem:[%s1400_s29 + $0x92] sm:$0xff]  ;;  %v1631_v51 = vld [vmem:[%s1400_s29 + $0x9a] sm:$0xff] }
  0x36   : > { %v550_v33 = vadd.f32 %v536_v43, %v502_v42  ;;  %v325_v59 = vadd.f32 %v311_v61, %v267_v54  ;;  %v326_v52 = vadd.f32 %v312_v63, %v268_v57  ;;  %v403_v0 = vmul.f32 %v1385_v6, %v1604_v10  ;;  %1943 = vst [vmem:[#allocation16_spill] sm:$0xff] %v1625_v47  ;;  %v1636_v54 = vld [vmem:[%s1400_s29 + $0xa8] sm:$0xff]  ;;  %v1641_v10 = vld [vmem:[%s1400_s29 + $0xb0] sm:$0xff] }
  0x37   : > { %1944 = vst [vmem:[#allocation17_spill] sm:$0xff] %v1628_v56  ;;  %1066 = vmatpush.bf16.msra.mxu1 %v1036_v34  ;;  %1067 = vmatpush.bf16.msra.mxu2 %v1036_v34  ;;  %v664_v26 = vpack.c.bf16 %v652_v32, %v651_v35  ;;  %v593_v41 = vadd.f32 %v579_v14, %v549_v17  ;;  %v1644_v35 = vld [vmem:[%s1400_s29 + $0xa9] sm:$0xff]  ;;  %v1647_v14 = vld [vmem:[%s1400_s29 + $0xb1] sm:$0xff] }
  0x38   : > { %1945 = vst [vmem:[#allocation18_spill] sm:$0xff] %v1631_v51  ;;  %v404_v43 = vmul.f32 %v1385_v6, %v1612_v58  ;;  %1068 = vmatpush.bf16.msra.mxu3 %v1036_v34  ;;  %v594_v57 = vadd.f32 %v580_v53, %v550_v33  ;;  %v369_v42 = vadd.f32 %v355_v22, %v325_v59  ;;  %v1656_v53 = vld [vmem:[%s1400_s29 + $0xaa] sm:$0xff]  ;;  %v1659_v22 = vld [vmem:[%s1400_s29 + $0xb2] sm:$0xff] }
  0x39   : > { %1946 = vst [vmem:[#allocation19_spill] sm:$0xff] %v1636_v54  ;;  %v370_v61 = vadd.f32 %v356_v28, %v326_v52  ;;  %v447_v63 = vmul.f32 %v1393_v7, %v1620_v36  ;;  %v637_v32 = vadd.f32 %v623_v27, %v593_v41  ;;  %v448_v17 = vmul.f32 %v1393_v7, %v1625_v47  ;;  %v241_v47 = vld [vmem:[%s1400_s29] sm:$0xff] }
  0x3a   : > { %1947 = vst [vmem:[#allocation20_spill] sm:$0xff] %v1641_v10  ;;  %v491_v59 = vmul.f32 %v1398_v8, %v1628_v56  ;;  %v492_v52 = vmul.f32 %v1398_v8, %v1631_v51  ;;  %745 = vmatpush.bf16.msra.mxu0 %v1036_v34  ;;  %751 = vmatmul.bf16.vlgmr.msra.gmra.mxu1 %v664_v26  ;;  %v242_v56 = vld [vmem:[%s1400_s29 + $0x8] sm:$0xff] }
  0x3b   : > { %1948 = vst [vmem:[#allocation21_spill] sm:$0xff] %v1644_v35  ;;  %v638_v28 = vadd.f32 %v624_v40, %v594_v57  ;;  %v417_v33 = vadd.f32 %v403_v0, %v369_v42  ;;  %v418_v27 = vadd.f32 %v404_v43, %v370_v61  ;;  %v539_v41 = vmul.f32 %v1405_v9, %v1636_v54  ;;  %v285_v36 = vld [vmem:[%s1400_s29 + $0x1] sm:$0xff]  ;;  %v286_v0 = vld [vmem:[%s1400_s29 + $0x9] sm:$0xff] }
  0x3c   : > { %1949 = vst [vmem:[#allocation22_spill] sm:$0xff] %v1647_v14  ;;  %v655_v51 = vadd.f32 %v1575_v62, %v637_v32  ;;  %v540_v58 = vmul.f32 %v1405_v9, %v1641_v10  ;;  %v583_v34 = vmul.f32 %v1492_v45, %v1644_v35  ;;  %v584_v26 = vmul.f32 %v1492_v45, %v1647_v14  ;;  %v329_v61 = vld [vmem:[%s1400_s29 + $0x2] sm:$0xff]  ;;  %v330_v54 = vld [vmem:[%s1400_s29 + $0xa] sm:$0xff] }
  0x3d   : > { %1950 = vst [vmem:[#allocation23_spill] sm:$0xff] %v1656_v53  ;;  %v656_v40 = vadd.f32 %v1575_v62, %v638_v28  ;;  %v461_v43 = vadd.f32 %v447_v63, %v417_v33  ;;  %v462_v57 = vadd.f32 %v448_v17, %v418_v27  ;;  %v627_v42 = vmul.f32 %v1503_v49, %v1656_v53 }
  0x3e   : > { %1951 = vst [vmem:[#allocation24_spill] sm:$0xff] %v1659_v22  ;;  %v628_v32 = vmul.f32 %v1503_v49, %v1659_v22  ;;  %v257_v10 = vmul.f32 %v1367_v2, %v241_v47  ;;  %v258_v35 = vmul.f32 %v1367_v2, %v242_v56  ;;  %v301_v15 = vmul.f32 %v1372_v3, %v285_v36 }
  0x3f   : > { %v666_v14 = vpack.c.bf16 %v656_v40, %v655_v51  ;;  %v505_v50 = vadd.f32 %v491_v59, %v461_v43  ;;  %v506_v21 = vadd.f32 %v492_v52, %v462_v57  ;;  %v302_v63 = vmul.f32 %v1372_v3, %v286_v0 }
  0x40   : > { %v315_v17 = vadd.f32 %v301_v15, %v257_v10  ;;  %v345_v28 = vmul.f32 %v1380_v5, %v329_v61  ;;  %v346_v33 = vmul.f32 %v1380_v5, %v330_v54  ;;  %v393_v27 = vmul.f32 %v1385_v6, %v1411_v11 }
  0x41   : > { %761 = vmatmul.bf16.vlgmr.msra.gmra.mxu2 %v666_v14  ;;  %v553_v22 = vadd.f32 %v539_v41, %v505_v50  ;;  %v554_v47 = vadd.f32 %v540_v58, %v506_v21  ;;  %v316_v53 = vadd.f32 %v302_v63, %v258_v35  ;;  %v394_v36 = vmul.f32 %v1385_v6, %v1414_v12 }
  0x42   : > { %v359_v56 = vadd.f32 %v345_v28, %v315_v17  ;;  %v437_v51 = vmul.f32 %v1393_v7, %v1417_v13  ;;  %v438_v15 = vmul.f32 %v1393_v7, %v1424_v16  ;;  %v481_v11 = vmul.f32 %v1398_v8, %v1429_v18 }
  0x43   : > { %v597_v10 = vadd.f32 %v583_v34, %v553_v22  ;;  %v598_v59 = vadd.f32 %v584_v26, %v554_v47  ;;  %v360_v54 = vadd.f32 %v346_v33, %v316_v53  ;;  %v482_v21 = vmul.f32 %v1398_v8, %v1432_v19 }
  0x44   : > { %v407_v14 = vadd.f32 %v393_v27, %v359_v56  ;;  %v529_v12 = vmul.f32 %v1405_v9, %v1441_v23  ;;  %v530_v50 = vmul.f32 %v1405_v9, %v1444_v24  ;;  %v573_v16 = vmul.f32 %v1492_v45, %v1447_v25 }
  0x45   : > { %v641_v13 = vadd.f32 %v627_v42, %v597_v10  ;;  %v642_v58 = vadd.f32 %v628_v32, %v598_v59  ;;  %v408_v35 = vadd.f32 %v394_v36, %v360_v54  ;;  %v574_v18 = vmul.f32 %v1492_v45, %v1454_v29 }
  0x46   : > { %v451_v52 = vadd.f32 %v437_v51, %v407_v14  ;;  %v617_v53 = vmul.f32 %v1503_v49, %v1457_v30  ;;  %v261_v19 = vmul.f32 %v1367_v2, %v1441_v23  ;;  %v262_v26 = vmul.f32 %v1367_v2, %v1444_v24 }
  0x47   : > { %v659_v22 = vadd.f32 %v1575_v62, %v641_v13  ;;  %v660_v41 = vadd.f32 %v1575_v62, %v642_v58  ;;  %v452_v34 = vadd.f32 %v438_v15, %v408_v35  ;;  %v305_v40 = vmul.f32 %v1372_v3, %v1447_v25 }
  0x48   : > { %v495_v0 = vadd.f32 %v481_v11, %v451_v52  ;;  %v306_v43 = vmul.f32 %v1372_v3, %v1454_v29  ;;  %v349_v57 = vmul.f32 %v1380_v5, %v1457_v30  ;;  %v350_v61 = vmul.f32 %v1380_v5, %v1460_v31  ;;  %v1952_v52 = vld [vmem:[#allocation6_spill] sm:$0xff] }
  0x49   : > { %v668_v42 = vpack.c.bf16 %v660_v41, %v659_v22  ;;  %v496_v23 = vadd.f32 %v482_v21, %v452_v34  ;;  %v397_v32 = vmul.f32 %v1385_v6, %v1472_v37  ;;  %v319_v24 = vadd.f32 %v305_v40, %v261_v19  ;;  %v1954_v34 = vld [vmem:[#allocation8_spill] sm:$0xff] }
  0x4a   : > { %v543_v63 = vadd.f32 %v529_v12, %v495_v0  ;;  %v320_v17 = vadd.f32 %v306_v43, %v262_v26  ;;  %v398_v25 = vmul.f32 %v1385_v6, %v1475_v38  ;;  %v618_v29 = vmul.f32 %v1503_v49, %v1460_v31 }
  0x4b   : > { %771 = vmatmul.bf16.vlgmr.msra.gmra.mxu3 %v668_v42  ;;  %v544_v28 = vadd.f32 %v530_v50, %v496_v23  ;;  %v441_v30 = vmul.f32 %v1393_v7, %v1478_v39  ;;  %v442_v33 = vmul.f32 %v1393_v7, %v1487_v44  ;;  %v363_v47 = vadd.f32 %v349_v57, %v319_v24  ;;  %v1956_v42 = vld [vmem:[#allocation10_spill] sm:$0xff] }
  0x4c   : > { %v587_v27 = vadd.f32 %v573_v16, %v543_v63  ;;  %v364_v37 = vadd.f32 %v350_v61, %v320_v17  ;;  %v485_v36 = vmul.f32 %v1398_v8, %v1495_v46  ;;  %v486_v38 = vmul.f32 %v1398_v8, %v1498_v48  ;;  %v1957_v61 = vld [vmem:[#allocation11_spill] sm:$0xff]  ;;  %v1958_v17 = vld [vmem:[#allocation12_spill] sm:$0xff] }
  0x4d   : > { %v588_v56 = vadd.f32 %v574_v18, %v544_v28  ;;  %v533_v51 = vmul.f32 %v1405_v9, %v1514_v55  ;;  %v534_v31 = vmul.f32 %v1405_v9, %v1523_v60  ;;  %v411_v15 = vadd.f32 %v397_v32, %v363_v47  ;;  %v1959_v28 = vld [vmem:[#allocation13_spill] sm:$0xff] }
  0x4e   : > { %v631_v39 = vadd.f32 %v617_v53, %v587_v27  ;;  %v412_v10 = vadd.f32 %v398_v25, %v364_v37  ;;  %v577_v44 = vmul.f32 %v1492_v45, %v1532_v1  ;;  %v578_v46 = vmul.f32 %v1492_v45, %v1535_v4  ;;  %v1953_v53 = vld [vmem:[#allocation7_spill] sm:$0xff]  ;;  %v1960_v27 = vld [vmem:[#allocation14_spill] sm:$0xff] }
  0x4f   : > { %v632_v59 = vadd.f32 %v618_v29, %v588_v56  ;;  %v621_v54 = vmul.f32 %v1503_v49, %v1543_v20  ;;  %v265_v48 = vmul.f32 %v1367_v2, %v1514_v55  ;;  %v455_v14 = vadd.f32 %v441_v30, %v411_v15  ;;  %v1961_v37 = vld [vmem:[#allocation15_spill] sm:$0xff] }
  0x50   : > { %v649_v11 = vadd.f32 %v1575_v62, %v631_v39  ;;  %v456_v21 = vadd.f32 %v442_v33, %v412_v10  ;;  %v266_v12 = vmul.f32 %v1367_v2, %v1523_v60  ;;  %v309_v13 = vmul.f32 %v1372_v3, %v1532_v1  ;;  %v1963_v39 = vld [vmem:[#allocation17_spill] sm:$0xff] }
  0x51   : > { %v650_v50 = vadd.f32 %v1575_v62, %v632_v59  ;;  %v310_v58 = vmul.f32 %v1372_v3, %v1535_v4  ;;  %v353_v35 = vmul.f32 %v1380_v5, %v1543_v20  ;;  %v499_v16 = vadd.f32 %v485_v36, %v455_v14  ;;  %v1955_v20 = vld [vmem:[#allocation9_spill] sm:$0xff] }
  0x52   : > { %v500_v55 = vadd.f32 %v486_v38, %v456_v21  ;;  %v354_v18 = vmul.f32 %v1380_v5, %v1952_v52  ;;  %v401_v19 = vmul.f32 %v1385_v6, %v1953_v53  ;;  %v323_v22 = vadd.f32 %v309_v13, %v265_v48  ;;  %v1964_v13 = vld [vmem:[#allocation18_spill] sm:$0xff] }
  0x53   : > { %v663_v60 = vpack.c.bf16 %v650_v50, %v649_v11  ;;  %v324_v41 = vadd.f32 %v310_v58, %v266_v12  ;;  %v402_v1 = vmul.f32 %v1385_v6, %v1954_v34  ;;  %v547_v26 = vadd.f32 %v533_v51, %v499_v16  ;;  %v1962_v51 = vld [vmem:[#allocation16_spill] sm:$0xff] }
  0x54   : > { %v548_v0 = vadd.f32 %v534_v31, %v500_v55  ;;  %v622_v4 = vmul.f32 %v1503_v49, %v1952_v52  ;;  %v445_v40 = vmul.f32 %v1393_v7, %v1955_v20  ;;  %v367_v43 = vadd.f32 %v353_v35, %v323_v22  ;;  %v1965_v55 = vld [vmem:[#allocation19_spill] sm:$0xff]  ;;  %v967_v20 = vld [vmem:[%s1400_s29 + $0xc0] sm:$0xff] }
  0x55   : > { %746 = vmatmul.bf16.vlgmr.msra.gmra.mxu0 %v663_v60  ;;  %v368_v57 = vadd.f32 %v354_v18, %v324_v41  ;;  %v446_v23 = vmul.f32 %v1393_v7, %v1956_v42  ;;  %v489_v32 = vmul.f32 %v1398_v8, %v1957_v61  ;;  %v591_v63 = vadd.f32 %v577_v44, %v547_v26  ;;  %v1967_v41 = vld [vmem:[#allocation21_spill] sm:$0xff] }
  0x56   : > { %v592_v24 = vadd.f32 %v578_v46, %v548_v0  ;;  %v490_v25 = vmul.f32 %v1398_v8, %v1958_v17  ;;  %v537_v29 = vmul.f32 %v1405_v9, %v1959_v28  ;;  %v415_v30 = vadd.f32 %v401_v19, %v367_v43  ;;  %v1966_v19 = vld [vmem:[#allocation20_spill] sm:$0xff] }
  0x57   : > { %v416_v33 = vadd.f32 %v402_v1, %v368_v57  ;;  %v538_v47 = vmul.f32 %v1405_v9, %v1960_v27  ;;  %v581_v36 = vmul.f32 %v1492_v45, %v1961_v37  ;;  %v635_v56 = vadd.f32 %v621_v54, %v591_v63  ;;  %v1968_v1 = vld [vmem:[#allocation22_spill] sm:$0xff]  ;;  %v983_v17 = vld [vmem:[%s1400_s29 + $0xc9] sm:$0xff] }
  0x58   : > { %v636_v38 = vadd.f32 %v622_v4, %v592_v24  ;;  %v582_v31 = vmul.f32 %v1492_v45, %v1962_v51  ;;  %v625_v15 = vmul.f32 %v1503_v49, %v1963_v39  ;;  %v459_v10 = vadd.f32 %v445_v40, %v415_v30  ;;  %v968_v40 = vld [vmem:[%s1400_s29 + $0xc8] sm:$0xff] }
  0x59   : > { %v460_v44 = vadd.f32 %v446_v23, %v416_v33  ;;  %v269_v59 = vmul.f32 %v1367_v2, %v1959_v28  ;;  %v270_v46 = vmul.f32 %v1367_v2, %v1960_v27  ;;  %v653_v48 = vadd.f32 %v1575_v62, %v635_v56  ;;  %v1970_v23 = vld [vmem:[#allocation24_spill] sm:$0xff]  ;;  %v982_v24 = vld [vmem:[%s1400_s29 + $0xc1] sm:$0xff] }
  0x5a   : > { %v654_v11 = vadd.f32 %v1575_v62, %v636_v38  ;;  %v313_v54 = vmul.f32 %v1372_v3, %v1961_v37  ;;  %v314_v14 = vmul.f32 %v1372_v3, %v1962_v51  ;;  %v503_v21 = vadd.f32 %v489_v32, %v459_v10  ;;  %v997_v27 = vld [vmem:[%s1400_s29 + $0xc2] sm:$0xff] }
  0x5b   : > { %v504_v12 = vadd.f32 %v490_v25, %v460_v44  ;;  %v357_v50 = vmul.f32 %v1380_v5, %v1963_v39  ;;  %v358_v58 = vmul.f32 %v1380_v5, %v1964_v13  ;;  %v405_v52 = vmul.f32 %v1385_v6, %v1965_v55 }
  0x5c   : > { %v665_v2 = vpack.c.bf16 %v654_v11, %v653_v48  ;;  %v327_v35 = vadd.f32 %v313_v54, %v269_v59  ;;  %v328_v16 = vadd.f32 %v314_v14, %v270_v46  ;;  %v551_v18 = vadd.f32 %v537_v29, %v503_v21 }
  0x5d   : > { %v552_v53 = vadd.f32 %v538_v47, %v504_v12  ;;  %v626_v3 = vmul.f32 %v1503_v49, %v1964_v13  ;;  %v406_v60 = vmul.f32 %v1385_v6, %v1966_v19  ;;  %v449_v34 = vmul.f32 %v1393_v7, %v1967_v41  ;;  %v1969_v6 = vld [vmem:[#allocation23_spill] sm:$0xff] }
  0x5e   : > { %756 = vmatmul.bf16.gmra.mxu1 %v665_v2  ;;  %v371_v5 = vadd.f32 %v357_v50, %v327_v35  ;;  %v372_v22 = vadd.f32 %v358_v58, %v328_v16  ;;  %v450_v26 = vmul.f32 %v1393_v7, %v1968_v1  ;;  %v595_v0 = vadd.f32 %v581_v36, %v551_v18  ;;  %v998_v47 = vld [vmem:[%s1400_s29 + $0xca] sm:$0xff]  ;;  %s229_s29 = sand.u32 1, %s1226_s19  }
  0x5f   : > { %v596_v4 = vadd.f32 %v582_v31, %v552_v53  ;;  %v493_v42 = vmul.f32 %v1398_v8, %v1969_v6  ;;  %v494_v61 = vmul.f32 %v1398_v8, %v1970_v23  ;;  %v541_v28 = vmul.f32 %v1405_v9, %v967_v20  ;;  %s1069_s27 = smul.u32 112, %s229_s29  ;;  %s797_s22 = scalar_lea.sflag [#allocation3], %s229_s29 }
  0x60   : > { %v419_v43 = vadd.f32 %v405_v52, %v371_v5  ;;  %v420_v57 = vadd.f32 %v406_v60, %v372_v22  ;;  %v639_v32 = vadd.f32 %v625_v15, %v595_v0  ;;  %v542_v29 = vmul.f32 %v1405_v9, %v968_v40 }
  0x61   : > { %v640_v63 = vadd.f32 %v626_v3, %v596_v4  ;;  %v585_v8 = vmul.f32 %v1492_v45, %v982_v24  ;;  %v586_v56 = vmul.f32 %v1492_v45, %v983_v17  ;;  %v629_v39 = vmul.f32 %v1503_v49, %v997_v27  ;;  %v1155_v45 = vld [vmem:[%s1901_s4] ss:$0 sm:$0xff]  ;;  %s1835_s9 = scalar_lea.vmem [#allocation2], %s1069_s27  ;;  %s1170_s27 = sshra.s32 %s815_s21, 4  ;;  %s1171_s27 = int_to_ptr.hbm [resolvable:$true] %s1170_s27 }
  0x62   : > { %v463_v25 = vadd.f32 %v449_v34, %v419_v43  ;;  %v464_v7 = vadd.f32 %v450_v26, %v420_v57  ;;  %v657_v30 = vadd.f32 %v1575_v62, %v639_v32  ;;  %v630_v9 = vmul.f32 %v1503_v49, %v998_v47  ;;  %s812_s26 = sshll.u32 %s1835_s9, 4  ;;  %s1172_s30 = scalar_lea.hbm %s1171_s27, 112  ;;  %s813_s26 = int_to_ptr.vmem [resolvable:$true] %s812_s26 }
  0x63   : > { %v658_v33 = vadd.f32 %v1575_v62, %v640_v63  ;;  %p1173_p13 = scmp.ne.s32.totalorder %s1171_s27, %s1172_s30  ;;  %p1177_p2 = scmp.lt.s32.totalorder %s1171_s27, %s1902_s5 }
  0x64   : > { %v507_v37 = vadd.f32 %v493_v42, %v463_v25  ;;  %v508_v36 = vadd.f32 %v494_v61, %v464_v7  ;;  %p1178_p4 = scmp.lt.s32.totalorder %s1176_s10, %s1172_s30 }
  0x65   : > { %v667_v38 = vpack.c.bf16 %v658_v33, %v657_v30  ;;  %p1174_p0 = pnand %p1173_p13, %p1335_p3 }
  0x66   : > { %v555_v51 = vadd.f32 %v541_v28, %v507_v37  ;;  %v556_v31 = vadd.f32 %v542_v29, %v508_v36  ;;  %p1179_p5 = por %p1178_p4, %p1177_p2 }
  0x67   : > { %766 = vmatmul.bf16.gmra.mxu2 %v667_v38  ;;  %p1175_p1 = pneg %p1174_p0 }
  0x68   : > { %v599_v15 = vadd.f32 %v585_v8, %v555_v51  ;;  %v600_v10 = vadd.f32 %v586_v56, %v556_v31 }
  0x69   : > { %p1180_p6 = pnand %p1179_p5, %p1175_p1 }
  0x6a   : > { %v643_v44 = vadd.f32 %v629_v39, %v599_v15  ;;  %v644_v59 = vadd.f32 %v630_v9, %v600_v10 }
  0x6c   : > { %v661_v46 = vadd.f32 %v1575_v62, %v643_v44  ;;  %v662_v48 = vadd.f32 %v1575_v62, %v644_v59 }
  0x6e   : > { %v669_v11 = vpack.c.bf16 %v662_v48, %v661_v46 }
  0x70   : > { %776 = vmatmul.bf16.gmra.mxu3 %v669_v11 }
  0xb7   : > { %v752_v54 = vpop.f32.mrf.mxu1 }
  0xb8   : > { %v753_v49 = vadd.f32 %v1155_v45, %v752_v54 }
  0xba   : > { %784 = vst [vmem:[%s1835_s9 + $0x10] sm:$0xff] %v753_v49 }
  0xbf   : > { %v754_v62 = vpop.f32.mrf.mxu1 }
  0xc0   : > { %v755_v14 = vadd.f32 %v1155_v45, %v754_v62 }
  0xc2   : > { %785 = vst [vmem:[%s1835_s9 + $0x18] sm:$0xff] %v755_v14 }
  0xc4   : > { %v762_v21 = vpop.f32.mrf.mxu2 }
  0xc5   : > { %v763_v12 = vadd.f32 %v1155_v45, %v762_v21 }
  0xc7   : > { %788 = vst [vmem:[%s1835_s9 + $0x30] sm:$0xff] %v763_v12 }
  0xcc   : > { %v764_v50 = vpop.f32.mrf.mxu2 }
  0xcd   : > { %v765_v13 = vadd.f32 %v1155_v45, %v764_v50 }
  0xce   : > { %v772_v58 = vpop.f32.mrf.mxu3 }
  0xcf   : > { %v773_v2 = vadd.f32 %v1155_v45, %v772_v58  ;;  %789 = vst [vmem:[%s1835_s9 + $0x38] sm:$0xff] %v765_v13 }
  0xd1   : > { %792 = vst [vmem:[%s1835_s9 + $0x50] sm:$0xff] %v773_v2 }
  0xd2   : > { %v747_v35 = vpop.f32.mrf.mxu0 }
  0xd3   : > { %v748_v16 = vadd.f32 %v1155_v45, %v747_v35 }
  0xd5   : > { %782 = vst [vmem:[%s1835_s9] sm:$0xff] %v748_v16 }
  0xd6   : > { %v774_v55 = vpop.f32.mrf.mxu3 }
  0xd7   : > { %v775_v52 = vadd.f32 %v1155_v45, %v774_v55 }
  0xd9   : > { %793 = vst [vmem:[%s1835_s9 + $0x58] sm:$0xff] %v775_v52 }
  0xda   : > { %v749_v18 = vpop.f32.mrf.mxu0 }
  0xdb   : > { %v757_v53 = vpop.f32.mrf.mxu1  ;;  %v750_v3 = vadd.f32 %v1155_v45, %v749_v18 }
  0xdc   : > { %v758_v19 = vadd.f32 %v1155_v45, %v757_v53 }
  0xdd   : > { %783 = vst [vmem:[%s1835_s9 + $0x8] sm:$0xff] %v750_v3 }
  0xde   : > { %786 = vst [vmem:[%s1835_s9 + $0x20] sm:$0xff] %v758_v19 }
  0xe3   : > { %v759_v60 = vpop.f32.mrf.mxu1 }
  0xe4   : > { %v760_v5 = vadd.f32 %v1155_v45, %v759_v60 }
  0xe6   : > { %787 = vst [vmem:[%s1835_s9 + $0x28] sm:$0xff] %v760_v5 }
  0xea   : > { %v767_v22 = vpop.f32.mrf.mxu2 }
  0xeb   : > { %v768_v41 = vadd.f32 %v1155_v45, %v767_v22 }
  0xed   : > { %790 = vst [vmem:[%s1835_s9 + $0x40] sm:$0xff] %v768_v41 }
  0xf2   : > { %v769_v34 = vpop.f32.mrf.mxu2 }
  0xf3   : > { %v777_v1 = vpop.f32.mrf.mxu3  ;;  %v770_v26 = vadd.f32 %v1155_v45, %v769_v34 }
  0xf4   : > { %v778_v0 = vadd.f32 %v1155_v45, %v777_v1 }
  0xf5   : > { %791 = vst [vmem:[%s1835_s9 + $0x48] sm:$0xff] %v770_v26 }
  0xf6   : > { %794 = vst [vmem:[%s1835_s9 + $0x60] sm:$0xff] %v778_v0 }
  0xfb   : > { %v779_v4 = vpop.f32.mrf.mxu3 }
  0xfc   : > { %v780_v20 = vadd.f32 %v1155_v45, %v779_v4 }
  0xfe   : > { %795 = vst [vmem:[%s1835_s9 + $0x68] sm:$0xff] %v780_v20 }
  0xff   : > { %1183 = shalt.err (!%p1180_p6)
}
 0x100   : > { %s1252_s29 = smov 128   ;;  %s1253_s9 = smov 8  }
 0x101   : > { %1072 = dma.vmem_to_hbm [thread:$0]  (%p1335_p3), %s813_s26, 1792, %s815_s21, %s797_s22, %s1252_s29, %s1252_s29, %s1253_s9  }
 0x102 PF: > { %p1078_p7 = scmp.ge.s32.totalorder %s1250_s25, 2  ;;  %s829_s12 = sand.u32 1, %s1222_s18  }
 0x103   : > { %s830_s16 = scalar_lea.sflag [#allocation3], %s829_s12 }
 0x104   : > { %p1075_p9 = pnand %p1078_p7, %p1344_p8 }
 0x106   : > { %p1076_p10 = pneg %p1075_p9 }
 0x108   : > { %1217 = dma.done.wait (%p1076_p10), %s830_s16, 1792  }
 0x109   : > { %1219 = vsyncadd (%p1076_p10), %s830_s16, 4294965504  ;;  %s18_s25 = sadd.s32 1, %s1250_s25   ;;  %s1971_s6 = sld [smem:[#allocation5_spill]] }
 0x10a   : > { %p15_p11 = scmp.ge.s32.totalorder %s18_s25, 6   ;;  %s1972_s18 = smov %s1226_s19 }
 0x10b   : > { %s1973_s19 = smov %s1230_s20  ;;  %s1974_s20 = smov %s1353_s11 }
 0x10c   : > { %s1975_s21 = smov %s1242_s23  ;;  %s1976_s22 = smov %s1246_s24 }
 0x10d   : > { %s1977_s23 = smov %s1980_s28  ;;  %17 = sbr.rel (!%p15_p11) target bundleno = 5 (0x5), region = 80 }
 0x10f   : > { %s1978_s24 = smov %s1971_s6 }
 0x112   :  { %836 = vsyncpa [#allocation3], 1 }
 0x113   :  { %838 = vsyncpa [#allocation3 + $0x1], 1 }

</bundles_post_ra>
